<compile_context>
chip_gen: v5e
topology: v5e:2x2
jax: 0.10.0
libtpu: 0.0.40
codegen_flags: <defaults>
</compile_context>

<pallas_src>
import functools

import jax
import jax.numpy as jnp
from jax.experimental import pallas as pl
from jax.experimental.pallas import tpu as pltpu


LANE = 128      # TPU lane width (last dim)
SUBLANE = 16    # sublane multiple that satisfies both f32 (8) and bf16 (16)


def _cdiv(a, b):
    return (a + b - 1) // b


def _round_up(n, m):
    return _cdiv(n, m) * m


def _pad2(a, rows, cols, value=0.0):
    r, c = a.shape
    if r == rows and c == cols:
        return a
    return jnp.pad(a, ((0, rows - r), (0, cols - c)), constant_values=value)


def _pick_batch_tiling(B, in_pad, hid_pad, cbytes, tile_budget_bytes=24 << 20):
    """Balanced batch tiles: <=512 rows, within a VMEM tile budget, and >=2
    tiles for mid/large batches so the 'parallel' axis feeds both v7x cores."""
    row_bytes = 2 * (in_pad * cbytes + hid_pad * 4 + hid_pad * 4)  # dbl-buffered x/h/out
    cap = (tile_budget_bytes // max(row_bytes, 1)) // SUBLANE * SUBLANE
    cap = max(SUBLANE, min(512, cap))
    n_bt = _cdiv(B, cap)
    if B >= 64:
        n_bt = max(n_bt, 2)
    bt = _round_up(_cdiv(B, n_bt), SUBLANE)
    return bt, n_bt, bt * n_bt


def _prepare_params(W_input, b_input, W_recurrent, time_constants,
                    in_pad, hid_pad, compute_dtype):
    """One-time weight/bias/tau prep (transpose + pad + cast). Hoist out of any
    per-step caller; `ltc_cell_sequence` already does this once per sequence."""
    f32 = jnp.float32
    w_in_p = _pad2(W_input.T.astype(f32), in_pad, hid_pad).astype(compute_dtype)
    w_rec_p = _pad2(W_recurrent.T.astype(f32), hid_pad, hid_pad).astype(compute_dtype)
    b_row = _pad2(b_input.reshape(1, -1).astype(f32), 1, hid_pad)
    # Pad tau with 1.0 so padded lanes never blow up the reciprocal.
    tau_row = _pad2(time_constants.reshape(1, -1).astype(f32), 1, hid_pad, value=1.0)
    return w_in_p, w_rec_p, b_row, tau_row


def _ltc_step_math(x, h32, w_in, w_rec, b, tau, leak, *, approx_recip):
    """Shared LTC update. h32 is the f32 hidden state; only the dot operand is
    cast to the MXU compute dtype."""
    combined = (jnp.dot(x, w_in, preferred_element_type=jnp.float32)
                + jnp.dot(h32.astype(w_rec.dtype), w_rec,
                          preferred_element_type=jnp.float32)
                + b)
    gates = jax.nn.sigmoid(combined)
    eff = tau * gates + 1e-6
    if approx_recip:
        dh_dt = (jnp.tanh(combined) - h32) * pl.reciprocal(eff, approx=True)
    else:
        dh_dt = (jnp.tanh(combined) - h32) / eff
    return h32 + leak * dh_dt


# --------------------------------------------------------------------------
# Single-step cell (matches LTCCell.forward exactly)
# --------------------------------------------------------------------------
def _ltc_cell_kernel(approx_recip,
                     leak_ref,    # SMEM (1,)            scalar-prefetch leak
                     x_ref,       # VMEM (bt, in_pad)     compute dtype
                     h_ref,       # VMEM (bt, hid_pad)    f32
                     w_in_ref,    # VMEM (in_pad, hid_pad)   compute dtype (resident)
                     w_rec_ref,   # VMEM (hid_pad, hid_pad)  compute dtype (resident)
                     b_ref,       # VMEM (1, hid_pad)     f32
                     tau_ref,     # VMEM (1, hid_pad)     f32
                     out_ref):    # VMEM (bt, hid_pad)    f32
    h_new = _ltc_step_math(x_ref[...], h_ref[...], w_in_ref[...], w_rec_ref[...],
                           b_ref[...], tau_ref[...], leak_ref[0],
                           approx_recip=approx_recip)
    out_ref[...] = h_new.astype(out_ref.dtype)


def ltc_cell(x, h_prev, W_input, b_input, W_recurrent, time_constants, leak,
             *, compute_dtype=jnp.float32, approx_reciprocal=True):
    """Pallas-backed LTCCell forward (single step).

    x:              (B, input_dim)   float32
    h_prev:         (B, hidden_dim)  float32 or None
    W_input:        (hidden_dim, input_dim)   (PyTorch nn.Linear layout)
    b_input:        (hidden_dim,)
    W_recurrent:    (hidden_dim, hidden_dim)
    time_constants: (hidden_dim,)
    leak:           scalar
    compute_dtype:  MXU operand dtype (f32 or bf16); state / accumulation /
                    gating math stay f32.
    """
    f32 = jnp.float32
    B, input_dim = x.shape
    hidden_dim = W_input.shape[0]
    if h_prev is None:
        h_prev = jnp.zeros((B, hidden_dim), f32)

    in_pad = _round_up(input_dim, LANE)
    hid_pad = _round_up(hidden_dim, LANE)
    cbytes = jnp.dtype(compute_dtype).itemsize
    bt, n_bt, b_pad = _pick_batch_tiling(B, in_pad, hid_pad, cbytes)

    x_p = _pad2(x.astype(f32), b_pad, in_pad).astype(compute_dtype)
    h_p = _pad2(h_prev.astype(f32), b_pad, hid_pad)          # state stays f32
    w_in_p, w_rec_p, b_row, tau_row = _prepare_params(
        W_input, b_input, W_recurrent, time_constants, in_pad, hid_pad, compute_dtype)
    leak_arr = jnp.asarray(leak, f32).reshape(1)

    weight_bytes = (in_pad + hid_pad) * hid_pad * cbytes
    tile_bytes = bt * (in_pad * cbytes + 2 * hid_pad * 4)
    needed = 2 * weight_bytes + 2 * tile_bytes + 4 * hid_pad * 4 + (2 << 20)
    vmem_limit = int(min(max(needed, 32 << 20), 128 << 20))

    out_pad = pl.pallas_call(
        functools.partial(_ltc_cell_kernel, approx_reciprocal),
        out_shape=jax.ShapeDtypeStruct((b_pad, hid_pad), f32),
        grid_spec=pltpu.PrefetchScalarGridSpec(
            num_scalar_prefetch=1,                 # leak -> SMEM
            grid=(n_bt,),
            in_specs=[
                pl.BlockSpec((bt, in_pad), lambda i, lk: (i, 0)),           # x
                pl.BlockSpec((bt, hid_pad), lambda i, lk: (i, 0)),          # h_prev
                pl.BlockSpec((in_pad, hid_pad), lambda i, lk: (0, 0)),      # W_in.T (resident)
                pl.BlockSpec((hid_pad, hid_pad), lambda i, lk: (0, 0)),     # W_rec.T (resident)
                pl.BlockSpec((1, hid_pad), lambda i, lk: (0, 0)),           # bias
                pl.BlockSpec((1, hid_pad), lambda i, lk: (0, 0)),           # tau
            ],
            out_specs=pl.BlockSpec((bt, hid_pad), lambda i, lk: (i, 0)),
        ),
        compiler_params=pltpu.CompilerParams(
            dimension_semantics=("parallel",),
            vmem_limit_bytes=vmem_limit),
    )(leak_arr, x_p, h_p, w_in_p, w_rec_p, b_row, tau_row)

    return out_pad[:B, :hidden_dim]


# --------------------------------------------------------------------------
# Fused sequence: T steps in one pallas_call (implements the old TODO)
# --------------------------------------------------------------------------
def _ltc_seq_kernel(approx_recip,
                    leak_ref,    # SMEM (1,)
                    x_ref,       # VMEM (1, bt, in_pad)    compute dtype (streamed)
                    h0_ref,      # VMEM (bt, hid_pad)      f32
                    w_in_ref,    # VMEM (in_pad, hid_pad)  compute dtype (resident)
                    w_rec_ref,   # VMEM (hid_pad, hid_pad) compute dtype (resident)
                    b_ref,       # VMEM (1, hid_pad)       f32
                    tau_ref,     # VMEM (1, hid_pad)       f32
                    out_ref,     # VMEM (1, bt, hid_pad)   f32
                    h_scr):      # VMEM (bt, hid_pad)      f32 carried state
    t = pl.program_id(1)

    @pl.when(t == 0)
    def _():
        h_scr[...] = h0_ref[...]

    h_new = _ltc_step_math(x_ref[0], h_scr[...], w_in_ref[...], w_rec_ref[...],
                           b_ref[...], tau_ref[...], leak_ref[0],
                           approx_recip=approx_recip)
    h_scr[...] = h_new
    out_ref[0] = h_new.astype(out_ref.dtype)


def ltc_cell_sequence(xs, h0, W_input, b_input, W_recurrent, time_constants, leak,
                      *, compute_dtype=jnp.float32, approx_reciprocal=False):
    """Run the LTC cell over a sequence xs of shape (T, B, input_dim) in ONE
    pallas_call.  Returns all hidden states, shape (T, B, hidden_dim)."""
    f32 = jnp.float32
    T, B, input_dim = xs.shape
    hidden_dim = W_input.shape[0]
    if h0 is None:
        h0 = jnp.zeros((B, hidden_dim), f32)

    in_pad = _round_up(input_dim, LANE)
    hid_pad = _round_up(hidden_dim, LANE)
    cbytes = jnp.dtype(compute_dtype).itemsize
    bt, n_bt, b_pad = _pick_batch_tiling(B, in_pad, hid_pad, cbytes)

    xs_p = jnp.pad(xs.astype(f32),
                   ((0, 0), (0, b_pad - B), (0, in_pad - input_dim))
                   ).astype(compute_dtype)
    h0_p = _pad2(h0.astype(f32), b_pad, hid_pad)
    w_in_p, w_rec_p, b_row, tau_row = _prepare_params(
        W_input, b_input, W_recurrent, time_constants, in_pad, hid_pad, compute_dtype)
    leak_arr = jnp.asarray(leak, f32).reshape(1)

    weight_bytes = (in_pad + hid_pad) * hid_pad * cbytes
    tile_bytes = bt * (in_pad * cbytes + 3 * hid_pad * 4)   # x, h0, out, scratch
    needed = 2 * weight_bytes + 2 * tile_bytes + 4 * hid_pad * 4 + (2 << 20)
    vmem_limit = int(min(max(needed, 32 << 20), 128 << 20))

    hs_pad = pl.pallas_call(
        functools.partial(_ltc_seq_kernel, approx_reciprocal),
        out_shape=jax.ShapeDtypeStruct((T, b_pad, hid_pad), f32),
        grid_spec=pltpu.PrefetchScalarGridSpec(
            num_scalar_prefetch=1,
            grid=(n_bt, T),                         # T innermost ("arbitrary")
            in_specs=[
                pl.BlockSpec((1, bt, in_pad), lambda i, t, lk: (t, i, 0)),    # x_t streamed
                pl.BlockSpec((bt, hid_pad), lambda i, t, lk: (i, 0)),         # h0
                pl.BlockSpec((in_pad, hid_pad), lambda i, t, lk: (0, 0)),     # W_in.T (resident)
                pl.BlockSpec((hid_pad, hid_pad), lambda i, t, lk: (0, 0)),    # W_rec.T (resident)
                pl.BlockSpec((1, hid_pad), lambda i, t, lk: (0, 0)),          # bias
                pl.BlockSpec((1, hid_pad), lambda i, t, lk: (0, 0)),          # tau
            ],
            out_specs=pl.BlockSpec((1, bt, hid_pad), lambda i, t, lk: (t, i, 0)),
            scratch_shapes=[pltpu.VMEM((bt, hid_pad), f32)],                  # carried h
        ),
        compiler_params=pltpu.CompilerParams(
            dimension_semantics=("parallel", "arbitrary"),
            vmem_limit_bytes=vmem_limit),
    )(leak_arr, xs_p, h0_p, w_in_p, w_rec_p, b_row, tau_row)

    return hs_pad[:, :B, :hidden_dim]


# --------------------------------------------------------------------------
# Pure-JAX references
# --------------------------------------------------------------------------
def ltc_cell_ref(x, h_prev, W_input, b_input, W_recurrent, time_constants, leak):
    combined = x @ W_input.T + b_input + h_prev @ W_recurrent.T
    gates = jax.nn.sigmoid(combined)
    effective_time = time_constants * gates
    dh_dt = (-h_prev + jnp.tanh(combined)) / (effective_time + 1e-6)
    return h_prev + leak * dh_dt


def ltc_cell_ref_lowp(x, h_prev, W_input, b_input, W_recurrent,
                      time_constants, leak):
    """Reference with bf16-rounded matmul operands only (state stays f32),
    matching the bf16 kernel path."""
    bf, f32 = jnp.bfloat16, jnp.float32
    combined = (jnp.dot(x.astype(bf), W_input.T.astype(bf), preferred_element_type=f32)
                + jnp.dot(h_prev.astype(bf), W_recurrent.T.astype(bf),
                          preferred_element_type=f32)
                + b_input)
    gates = jax.nn.sigmoid(combined)
    effective_time = time_constants * gates
    dh_dt = (-h_prev + jnp.tanh(combined)) / (effective_time + 1e-6)
    return h_prev + leak * dh_dt


def ltc_sequence_ref(xs, h0, W_input, b_input, W_recurrent, time_constants, leak):
    def step(h, x):
        h_new = ltc_cell_ref(x, h, W_input, b_input, W_recurrent, time_constants, leak)
        return h_new, h_new
    _, hs = jax.lax.scan(step, h0, xs)
    return hs


if __name__ == "__main__":
    # Small shapes consistent with the module: batch=8, input_dim=16, hidden_dim=32.
    B, input_dim, hidden_dim = 8, 16, 32

    key = jax.random.PRNGKey(0)
    k_x, k_h, k_wi, k_bi, k_wr, k_tau, k_seq = jax.random.split(key, 7)

    x = jax.random.normal(k_x, (B, input_dim), jnp.float32)
    h_prev = jax.random.normal(k_h, (B, hidden_dim), jnp.float32)

    # Deterministic parameter init (shapes per LTCCell.__init__).
    W_input = jax.random.normal(k_wi, (hidden_dim, input_dim), jnp.float32) * 0.1
    b_input = jax.random.normal(k_bi, (hidden_dim,), jnp.float32) * 0.1
    W_recurrent = jax.random.normal(k_wr, (hidden_dim, hidden_dim), jnp.float32) * 0.1
    time_constants = jax.random.uniform(k_tau, (hidden_dim,), jnp.float32) * 0.9 + 0.1
    leak = jnp.float32(0.1)

    # --- single step, f32 operands (only approx reciprocal differs from ref) ---
    out = jax.block_until_ready(
        ltc_cell(x, h_prev, W_input, b_input, W_recurrent, time_constants, leak))
    ref = ltc_cell_ref(x, h_prev, W_input, b_input, W_recurrent, time_constants, leak)
    assert out.shape == (B, hidden_dim)
    assert bool(jnp.all(jnp.isfinite(out)))
    assert jnp.allclose(out, ref, atol=2e-2, rtol=2e-2), "mismatch vs f32 reference"

    # --- h_prev = None default path (zeros hidden state) ---
    out0 = jax.block_until_ready(
        ltc_cell(x, None, W_input, b_input, W_recurrent, time_constants, leak))
    h0_zeros = jnp.zeros((B, hidden_dim), jnp.float32)
    ref0 = ltc_cell_ref(x, h0_zeros, W_input, b_input, W_recurrent, time_constants, leak)
    assert jnp.allclose(out0, ref0, atol=2e-2, rtol=2e-2), "mismatch vs f32 reference (h0)"

    # --- bf16 MXU-operand fast path (state kept in f32), vs bf16-matched ref ---
    out_bf = jax.block_until_ready(
        ltc_cell(x, h_prev, W_input, b_input, W_recurrent, time_constants, leak,
                 compute_dtype=jnp.bfloat16))
    ref_bf = ltc_cell_ref_lowp(x, h_prev, W_input, b_input, W_recurrent,
                               time_constants, leak)
    assert jnp.allclose(out_bf, ref_bf, atol=2e-2, rtol=2e-2), "mismatch vs bf16 reference"

    # --- fused-sequence kernel: T steps in one pallas_call ---
    # Stable-dynamics test regime (larger taus, smaller leak) so the recurrent
    # map doesn't amplify tiny rounding differences across steps.
    T = 8
    xs = jax.random.normal(k_seq, (T, B, input_dim), jnp.float32)
    tau_seq = jax.random.uniform(k_tau, (hidden_dim,), jnp.float32) * 0.5 + 0.5
    leak_seq = jnp.float32(0.05)

    hs = jax.block_until_ready(
        ltc_cell_sequence(xs, h_prev, W_input, b_input, W_recurrent, tau_seq, leak_seq))
    hs_ref = ltc_sequence_ref(xs, h_prev, W_input, b_input, W_recurrent, tau_seq, leak_seq)
    assert hs.shape == (T, B, hidden_dim)
    assert bool(jnp.all(jnp.isfinite(hs)))
    assert jnp.allclose(hs, hs_ref, atol=2e-2, rtol=2e-2), "mismatch vs sequence reference"

    print("KERNEL_OK")
</pallas_src>

<mosaic_0001>
module attributes {stable_mosaic.version = 11 : i64} {
  func.func @_ltc_cell_kernel(%arg0: i32, %arg1: memref<1xf32, #tpu.memory_space<smem>>, %arg2: memref<16x128xf32, #tpu.memory_space<vmem>>, %arg3: memref<16x128xf32, #tpu.memory_space<vmem>>, %arg4: memref<128x128xf32, #tpu.memory_space<vmem>>, %arg5: memref<128x128xf32, #tpu.memory_space<vmem>>, %arg6: memref<1x128xf32, #tpu.memory_space<vmem>>, %arg7: memref<1x128xf32, #tpu.memory_space<vmem>>, %arg8: memref<16x128xf32, #tpu.memory_space<vmem>>) attributes {dimension_semantics = [#tpu.dimension_semantics<parallel>], iteration_bounds = array<i64: 1>, scalar_prefetch = 1 : i64, scratch_operands = 0 : i64, tpu.core_type = #tpu.core_type<tc>, window_params = [{transform_indices = @transform_0, window_bounds = array<i64: 16, 128>}, {transform_indices = @transform_1, window_bounds = array<i64: 16, 128>}, {pipeline_mode = #tpu.pipeline_mode<synchronous>, transform_indices = @transform_2, window_bounds = array<i64: 128, 128>}, {pipeline_mode = #tpu.pipeline_mode<synchronous>, transform_indices = @transform_3, window_bounds = array<i64: 128, 128>}, {pipeline_mode = #tpu.pipeline_mode<synchronous>, transform_indices = @transform_4, window_bounds = array<i64: 1, 128>}, {pipeline_mode = #tpu.pipeline_mode<synchronous>, transform_indices = @transform_5, window_bounds = array<i64: 1, 128>}, {transform_indices = @transform_6, window_bounds = array<i64: 16, 128>}]} {
    %c0 = arith.constant 0 : index
    %c0_0 = arith.constant 0 : index
    %0 = vector.load %arg2[%c0, %c0_0] : memref<16x128xf32, #tpu.memory_space<vmem>>, vector<16x128xf32>
    %c0_1 = arith.constant 0 : index
    %c0_2 = arith.constant 0 : index
    %1 = vector.load %arg3[%c0_1, %c0_2] : memref<16x128xf32, #tpu.memory_space<vmem>>, vector<16x128xf32>
    %c0_3 = arith.constant 0 : index
    %c0_4 = arith.constant 0 : index
    %2 = vector.load %arg4[%c0_3, %c0_4] : memref<128x128xf32, #tpu.memory_space<vmem>>, vector<128x128xf32>
    %c0_5 = arith.constant 0 : index
    %c0_6 = arith.constant 0 : index
    %3 = vector.load %arg5[%c0_5, %c0_6] : memref<128x128xf32, #tpu.memory_space<vmem>>, vector<128x128xf32>
    %c0_7 = arith.constant 0 : index
    %c0_8 = arith.constant 0 : index
    %4 = vector.load %arg6[%c0_7, %c0_8] : memref<1x128xf32, #tpu.memory_space<vmem>>, vector<1x128xf32>
    %c0_9 = arith.constant 0 : index
    %c0_10 = arith.constant 0 : index
    %5 = vector.load %arg7[%c0_9, %c0_10] : memref<1x128xf32, #tpu.memory_space<vmem>>, vector<1x128xf32>
    %c0_11 = arith.constant 0 : index
    %6 = memref.load %arg1[%c0_11] : memref<1xf32, #tpu.memory_space<smem>>
    %cst = arith.constant dense<0.000000e+00> : vector<16x128xf32>
    %7 = tpu.matmul %0, %2, %cst {dimension_numbers = #tpu.dot_dimension_numbers<[1], [0], [0], [1], [0, 0, 1, 1], [], []>} : vector<16x128xf32>, vector<128x128xf32>, vector<16x128xf32> -> vector<16x128xf32>
    %cst_12 = arith.constant dense<0.000000e+00> : vector<16x128xf32>
    %8 = tpu.matmul %1, %3, %cst_12 {dimension_numbers = #tpu.dot_dimension_numbers<[1], [0], [0], [1], [0, 0, 1, 1], [], []>} : vector<16x128xf32>, vector<128x128xf32>, vector<16x128xf32> -> vector<16x128xf32>
    %9 = arith.addf %7, %8 : vector<16x128xf32>
    %10 = vector.broadcast %4 : vector<1x128xf32> to vector<16x128xf32>
    %11 = arith.addf %9, %10 : vector<16x128xf32>
    %12 = arith.negf %11 : vector<16x128xf32>
    %13 = math.exp %12 : vector<16x128xf32>
    %cst_13 = arith.constant 1.000000e+00 : f32
    %14 = vector.broadcast %cst_13 : f32 to vector<16x128xf32>
    %15 = arith.addf %14, %13 : vector<16x128xf32>
    %16 = arith.divf %14, %15 : vector<16x128xf32>
    %17 = vector.broadcast %5 : vector<1x128xf32> to vector<16x128xf32>
    %18 = arith.mulf %17, %16 : vector<16x128xf32>
    %cst_14 = arith.constant 9.99999997E-7 : f32
    %19 = vector.broadcast %cst_14 : f32 to vector<16x128xf32>
    %20 = arith.addf %18, %19 : vector<16x128xf32>
    %21 = math.tanh %11 : vector<16x128xf32>
    %22 = arith.subf %21, %1 : vector<16x128xf32>
    %23 = tpu.reciprocal %20 {approx = true} : vector<16x128xf32> -> vector<16x128xf32>
    %24 = arith.mulf %22, %23 : vector<16x128xf32>
    %25 = vector.broadcast %6 : f32 to vector<16x128xf32>
    %26 = arith.mulf %25, %24 : vector<16x128xf32>
    %27 = arith.addf %1, %26 : vector<16x128xf32>
    %c0_15 = arith.constant 0 : index
    %c0_16 = arith.constant 0 : index
    %28 = vector.load %arg8[%c0_15, %c0_16] : memref<16x128xf32, #tpu.memory_space<vmem>>, vector<16x128xf32>
    tpu.vector_store %arg8[%c0_15, %c0_16], %27 {strides = array<i32>} : memref<16x128xf32, #tpu.memory_space<vmem>>, vector<16x128xf32>,
    return
  }
  func.func @transform_0(%arg0: i32, %arg1: memref<1xf32, #tpu.memory_space<smem>>) -> (i32, i32) {
    %c0_i32 = arith.constant 0 : i32
    %c0_i32_0 = arith.constant 0 : i32
    return %arg0, %c0_i32 : i32, i32
  }
  func.func @transform_1(%arg0: i32, %arg1: memref<1xf32, #tpu.memory_space<smem>>) -> (i32, i32) {
    %c0_i32 = arith.constant 0 : i32
    %c0_i32_0 = arith.constant 0 : i32
    return %arg0, %c0_i32 : i32, i32
  }
  func.func @transform_2(%arg0: i32, %arg1: memref<1xf32, #tpu.memory_space<smem>>) -> (i32, i32) {
    %c0_i32 = arith.constant 0 : i32
    %c0_i32_0 = arith.constant 0 : i32
    %c0_i32_1 = arith.constant 0 : i32
    return %c0_i32, %c0_i32_0 : i32, i32
  }
  func.func @transform_3(%arg0: i32, %arg1: memref<1xf32, #tpu.memory_space<smem>>) -> (i32, i32) {
    %c0_i32 = arith.constant 0 : i32
    %c0_i32_0 = arith.constant 0 : i32
    %c0_i32_1 = arith.constant 0 : i32
    return %c0_i32, %c0_i32_0 : i32, i32
  }
  func.func @transform_4(%arg0: i32, %arg1: memref<1xf32, #tpu.memory_space<smem>>) -> (i32, i32) {
    %c0_i32 = arith.constant 0 : i32
    %c0_i32_0 = arith.constant 0 : i32
    %c0_i32_1 = arith.constant 0 : i32
    return %c0_i32, %c0_i32_0 : i32, i32
  }
  func.func @transform_5(%arg0: i32, %arg1: memref<1xf32, #tpu.memory_space<smem>>) -> (i32, i32) {
    %c0_i32 = arith.constant 0 : i32
    %c0_i32_0 = arith.constant 0 : i32
    %c0_i32_1 = arith.constant 0 : i32
    return %c0_i32, %c0_i32_0 : i32, i32
  }
  func.func @transform_6(%arg0: i32, %arg1: memref<1xf32, #tpu.memory_space<smem>>) -> (i32, i32) {
    %c0_i32 = arith.constant 0 : i32
    %c0_i32_0 = arith.constant 0 : i32
    return %arg0, %c0_i32 : i32, i32
  }
}

</mosaic_0001>

<bundles_post_ra>
// kernel: tpu_custom_call.1
= control target key start
LH: loop header
LB: loop body
LE: loop exit
PB: predicated region body
PF: predicated region fallthrough
CT: control target
= control target key end

     0   :  { %13 = vsyncpa [#allocation5], 0  ;;  %s543_s0 = inlined_call_operand.<no memory space> [shape: f32[1], index: 0, kind: input, shape index: {}]   ;;  %s544_s1 = inlined_call_operand.hbm [shape: f32[16,128], index: 1, kind: input, shape index: {}]   ;;  %s545_s2 = inlined_call_operand.hbm [shape: f32[16,128], index: 2, kind: input, shape index: {}]   ;;  %s546_s3 = inlined_call_operand.hbm [shape: f32[128,128], index: 3, kind: input, shape index: {}]   ;;  %s547_s4 = inlined_call_operand.hbm [shape: f32[128,128], index: 4, kind: input, shape index: {}]   ;;  %s548_s5 = inlined_call_operand.vmem [shape: f32[1,128], index: 5, kind: input, shape index: {}]   ;;  %s549_s6 = inlined_call_operand.vmem [shape: f32[1,128], index: 6, kind: input, shape index: {}]   ;;  %s550_s7 = inlined_call_operand.hbm [shape: f32[16,128], index: 7, kind: output, shape index: {}]  }
   0x1   :  { %14 = vsyncpa [#allocation8], 0 }
   0x2   :  { %15 = vsyncpa [#allocation11], 0 }
   0x3   :  { %16 = vsyncpa [#allocation6], 0  ;;  %s34_s26 = sshll.u32 %s545_s2, 4  ;;  %s447_s27 = smov [#allocation7]   ;;  %s35_s26 = int_to_ptr.hbm [resolvable:$true] %s34_s26 }
   0x4   :  { %s36_s28 = sshll.u32 %s447_s27, 4  ;;  %s21_s8 = sshll.u32 %s544_s1, 4  ;;  %s37_s28 = int_to_ptr.vmem [resolvable:$true] %s36_s28  ;;  %s22_s8 = int_to_ptr.hbm [resolvable:$true] %s21_s8 }
   0x5   :  { %s448_s9 = smov 128   ;;  %s449_s10 = smov 8  }
   0x6   :  { %42 = dma.hbm_to_vmem [thread:$0]  %s35_s26, 256, %s37_s28, [#allocation8], %s448_s9, %s448_s9, %s449_s10  }
   0x7   :  { %s450_s11 = smov [#allocation4]   ;;  %s47_s2 = sshll.u32 %s546_s3, 4  ;;  %s48_s2 = int_to_ptr.hbm [resolvable:$true] %s47_s2 }
   0x8   :  { %s23_s12 = sshll.u32 %s450_s11, 4  ;;  %s60_s16 = sshll.u32 %s547_s4, 4  ;;  %s24_s12 = int_to_ptr.vmem [resolvable:$true] %s23_s12  ;;  %s61_s16 = int_to_ptr.hbm [resolvable:$true] %s60_s16 }
   0x9   :  { %29 = dma.hbm_to_vmem [thread:$0]  %s22_s8, 256, %s24_s12, [#allocation5], %s448_s9, %s448_s9, %s449_s10  }
   0xa   :  { %s451_s17 = smov [#allocation9]   ;;  %s452_s19 = smov [#allocation10]  }
   0xb   :  { %s49_s18 = sshll.u32 %s451_s17, 4  ;;  %s62_s3 = sshll.u32 %s452_s19, 4  ;;  %s50_s18 = int_to_ptr.vmem [resolvable:$true] %s49_s18  ;;  %s63_s3 = int_to_ptr.vmem [resolvable:$true] %s62_s3 }
   0xc   :  { %55 = dma.hbm_to_vmem [thread:$0]  %s48_s2, 2048, %s50_s18, [#allocation8], %s448_s9, %s448_s9, %s449_s10  }
   0xd   :  { %68 = dma.hbm_to_vmem [thread:$0]  %s61_s16, 2048, %s63_s3, [#allocation11], %s448_s9, %s448_s9, %s449_s10  }
   0xe   :  { %439 = dma.done.wait [#allocation5], 256  }
   0xf   :  { %440 = vsyncadd [#allocation5], 4294967040 }
  0x10   :  { %441 = dma.done.wait [#allocation8], 2304  }
  0x11   :  { %442 = vsyncadd [#allocation8], 4294964992 }
  0x12   :  { %443 = dma.done.wait [#allocation11], 2048  }
  0x13   :  { %444 = vsyncadd [#allocation11], 4294965248  ;;  %v124_v0 = vld [vmem:[#allocation10 + $0x78] sm:$0xff]  ;;  %v123_v2 = vld [vmem:[#allocation10 + $0x70] sm:$0xff]  ;;  %s453_s23 = smov [#allocation12]   ;;  %s245_s27 = sshll.u32 %s550_s7, 4  ;;  %s246_s27 = int_to_ptr.hbm [resolvable:$true] %s245_s27 }
  0x14   :  { %v108_v1 = vld [vmem:[#allocation9 + $0x78] sm:$0xff]  ;;  %128 = vmatpush.msra.mxu0 %v124_v0  ;;  %262 = vmatpush.msra.mxu2 %v124_v0  ;;  %v107_v3 = vld [vmem:[#allocation9 + $0x70] sm:$0xff]  ;;  %v122_v4 = vld [vmem:[#allocation10 + $0x68] sm:$0xff]  ;;  %s243_s24 = sshll.u32 %s453_s23, 4  ;;  %s244_s24 = int_to_ptr.vmem [resolvable:$true] %s243_s24 }
  0x15   :  { %151 = vmatpush.msra.mxu1 %v108_v1  ;;  %278 = vmatpush.msra.mxu3 %v108_v1  ;;  %v106_v5 = vld [vmem:[#allocation9 + $0x68] sm:$0xff]  ;;  %v121_v6 = vld [vmem:[#allocation10 + $0x60] sm:$0xff]  ;;  %v120_v8 = vld [vmem:[#allocation10 + $0x58] sm:$0xff] }
  0x16   :  { %129 = vmatpush.msra.mxu0 %v123_v2  ;;  %263 = vmatpush.msra.mxu2 %v123_v2  ;;  %v105_v7 = vld [vmem:[#allocation9 + $0x60] sm:$0xff]  ;;  %v104_v9 = vld [vmem:[#allocation9 + $0x58] sm:$0xff]  ;;  %v119_v10 = vld [vmem:[#allocation10 + $0x50] sm:$0xff] }
  0x17   :  { %152 = vmatpush.msra.mxu1 %v107_v3  ;;  %279 = vmatpush.msra.mxu3 %v107_v3  ;;  %v103_v11 = vld [vmem:[#allocation9 + $0x50] sm:$0xff]  ;;  %v118_v12 = vld [vmem:[#allocation10 + $0x48] sm:$0xff]  ;;  %v117_v14 = vld [vmem:[#allocation10 + $0x40] sm:$0xff] }
  0x18   :  { %130 = vmatpush.msra.mxu0 %v122_v4  ;;  %264 = vmatpush.msra.mxu2 %v122_v4  ;;  %v102_v13 = vld [vmem:[#allocation9 + $0x48] sm:$0xff]  ;;  %v101_v15 = vld [vmem:[#allocation9 + $0x40] sm:$0xff]  ;;  %v116_v16 = vld [vmem:[#allocation10 + $0x38] sm:$0xff] }
  0x19   :  { %153 = vmatpush.msra.mxu1 %v106_v5  ;;  %280 = vmatpush.msra.mxu3 %v106_v5  ;;  %v100_v17 = vld [vmem:[#allocation9 + $0x38] sm:$0xff]  ;;  %v115_v18 = vld [vmem:[#allocation10 + $0x30] sm:$0xff]  ;;  %v114_v20 = vld [vmem:[#allocation10 + $0x28] sm:$0xff] }
  0x1a   :  { %131 = vmatpush.msra.mxu0 %v121_v6  ;;  %265 = vmatpush.msra.mxu2 %v121_v6  ;;  %v99_v19 = vld [vmem:[#allocation9 + $0x30] sm:$0xff]  ;;  %v98_v21 = vld [vmem:[#allocation9 + $0x28] sm:$0xff]  ;;  %v113_v22 = vld [vmem:[#allocation10 + $0x20] sm:$0xff] }
  0x1b   :  { %154 = vmatpush.msra.mxu1 %v105_v7  ;;  %281 = vmatpush.msra.mxu3 %v105_v7  ;;  %v97_v23 = vld [vmem:[#allocation9 + $0x20] sm:$0xff]  ;;  %v112_v24 = vld [vmem:[#allocation10 + $0x18] sm:$0xff]  ;;  %v111_v26 = vld [vmem:[#allocation10 + $0x10] sm:$0xff] }
  0x1c   :  { %132 = vmatpush.msra.mxu0 %v120_v8  ;;  %266 = vmatpush.msra.mxu2 %v120_v8  ;;  %v96_v25 = vld [vmem:[#allocation9 + $0x18] sm:$0xff]  ;;  %v95_v27 = vld [vmem:[#allocation9 + $0x10] sm:$0xff]  ;;  %v110_v28 = vld [vmem:[#allocation10 + $0x8] sm:$0xff] }
  0x1d   :  { %155 = vmatpush.msra.mxu1 %v104_v9  ;;  %282 = vmatpush.msra.mxu3 %v104_v9  ;;  %v94_v29 = vld [vmem:[#allocation9 + $0x8] sm:$0xff]  ;;  %v109_v30 = vld [vmem:[#allocation10] sm:$0xff]  ;;  %v518_v32 = vld [vmem:[#allocation7] sm:$0xff] }
  0x1e   :  { %133 = vmatpush.msra.mxu0 %v119_v10  ;;  %267 = vmatpush.msra.mxu2 %v119_v10  ;;  %v93_v31 = vld [vmem:[#allocation9] sm:$0xff]  ;;  %v520_v33 = vld [vmem:[#allocation7 + $0x8] sm:$0xff]  ;;  %v90_v35 = vld [vmem:[#allocation4 + $0x8] sm:$0xff] }
  0x1f   :  { %156 = vmatpush.msra.mxu1 %v103_v11  ;;  %283 = vmatpush.msra.mxu3 %v103_v11  ;;  %v89_v34 = vld [vmem:[#allocation4] sm:$0xff] }
  0x20   :  { %134 = vmatpush.msra.mxu0 %v118_v12  ;;  %268 = vmatpush.msra.mxu2 %v118_v12  ;;  %v301_v37 = vld [vmem:[%s548_s5] ss:$0 sm:$0xff] }
  0x21   :  { %157 = vmatpush.msra.mxu1 %v102_v13  ;;  %284 = vmatpush.msra.mxu3 %v102_v13  ;;  %v302_v60 = vld [vmem:[%s549_s6] ss:$0 sm:$0xff] }
  0x22   :  { %135 = vmatpush.msra.mxu0 %v117_v14  ;;  %269 = vmatpush.msra.mxu2 %v117_v14 }
  0x23   :  { %158 = vmatpush.msra.mxu1 %v101_v15  ;;  %285 = vmatpush.msra.mxu3 %v101_v15  ;;  %v232_v15 = vstv %s543_s0 }
  0x24   :  { %136 = vmatpush.msra.mxu0 %v116_v16  ;;  %270 = vmatpush.msra.mxu2 %v116_v16 }
  0x25   :  { %159 = vmatpush.msra.mxu1 %v100_v17  ;;  %286 = vmatpush.msra.mxu3 %v100_v17 }
  0x26   :  { %137 = vmatpush.msra.mxu0 %v115_v18  ;;  %271 = vmatpush.msra.mxu2 %v115_v18 }
  0x27   :  { %160 = vmatpush.msra.mxu1 %v99_v19  ;;  %287 = vmatpush.msra.mxu3 %v99_v19 }
  0x28   :  { %138 = vmatpush.msra.mxu0 %v114_v20  ;;  %272 = vmatpush.msra.mxu2 %v114_v20 }
  0x29   :  { %161 = vmatpush.msra.mxu1 %v98_v21  ;;  %288 = vmatpush.msra.mxu3 %v98_v21 }
  0x2a   :  { %139 = vmatpush.msra.mxu0 %v113_v22  ;;  %273 = vmatpush.msra.mxu2 %v113_v22 }
  0x2b   :  { %162 = vmatpush.msra.mxu1 %v97_v23  ;;  %289 = vmatpush.msra.mxu3 %v97_v23 }
  0x2c   :  { %140 = vmatpush.msra.mxu0 %v112_v24  ;;  %274 = vmatpush.msra.mxu2 %v112_v24 }
  0x2d   :  { %163 = vmatpush.msra.mxu1 %v96_v25  ;;  %290 = vmatpush.msra.mxu3 %v96_v25 }
  0x2e   :  { %141 = vmatpush.msra.mxu0 %v111_v26  ;;  %275 = vmatpush.msra.mxu2 %v111_v26 }
  0x2f   :  { %164 = vmatpush.msra.mxu1 %v95_v27  ;;  %291 = vmatpush.msra.mxu3 %v95_v27 }
  0x30   :  { %142 = vmatpush.msra.mxu0 %v110_v28  ;;  %276 = vmatpush.msra.mxu2 %v110_v28 }
  0x31   :  { %165 = vmatpush.msra.mxu1 %v94_v29  ;;  %292 = vmatpush.msra.mxu3 %v94_v29 }
  0x32   :  { %143 = vmatpush.msra.mxu0 %v109_v30  ;;  %277 = vmatpush.msra.mxu2 %v109_v30 }
  0x33   :  { %166 = vmatpush.msra.mxu1 %v93_v31  ;;  %293 = vmatpush.msra.mxu3 %v93_v31 }
  0x34   :  { %144 = vmatmul.f32.vlgmr.msra.gmra.mxu0 %v518_v32  ;;  %147 = vmatmul.f32.vlgmr.msra.gmra.mxu2 %v520_v33 }
  0x35   :  { %167 = vmatmul.f32.vlgmr.msra.gmra.mxu1 %v89_v34  ;;  %170 = vmatmul.f32.vlgmr.msra.gmra.mxu3 %v90_v35 }
  0xb1   :  { %v145_v36 = vpop.f32.mrf.mxu0 }
  0xb2   :  { %v168_v38 = vpop.f32.mrf.mxu1 }
  0xb3   :  { %v169_v39 = vadd.f32 %v168_v38, %v145_v36 }
  0xb5   :  { %v177_v40 = vadd.f32 %v301_v37, %v169_v39 }
  0xb7   :  { %v260_v41 = vmul.f32 -1.442695, %v177_v40  ;;  %v148_v42 = vpop.f32.mrf.mxu2 }
  0xb8   :  { %v171_v43 = vpop.f32.mrf.mxu3 }
  0xb9   :  { %303 = vpow2.f32 %v260_v41  ;;  %v172_v44 = vadd.f32 %v171_v43, %v148_v42 }
  0xbb   :  { %v178_v45 = vadd.f32 %v301_v37, %v172_v44 }
  0xbd   :  { %v261_v46 = vmul.f32 -1.442695, %v178_v45 }
  0xbf   :  { %v304_v47 = vpop.eup %303  ;;  %305 = vpow2.f32 %v261_v46 }
  0xc0   :  { %v185_v48 = vadd.f32 1.0, %v304_v47 }
  0xc2   :  { %307 = vrcp.f32 %v185_v48  ;;  %v198_v54 = vand.u32 2147483648, %v185_v48  ;;  %vm192_vm0 = vweird.f32 %v185_v48  ;;  %v196_v56 = vand.u32 2147483647, %v185_v48 }
  0xc4   :  { %v199_v61 = vor.u32 1.1754944e-38, %v198_v54  ;;  %vm197_vm3 = vcmp.eq.f32.partialorder %v196_v56, 8.507059e+37 }
  0xc5   :  { %v306_v49 = vpop.eup %305 }
  0xc6   :  { %v186_v50 = vadd.f32 1.0, %v306_v49 }
  0xc8   :  { %v308_v51 = vpop.eup %307  ;;  %309 = vrcp.f32 %v186_v50  ;;  %v213_v0 = vand.u32 2147483648, %v186_v50  ;;  %v211_v3 = vand.u32 2147483647, %v186_v50  ;;  %vm207_vm5 = vweird.f32 %v186_v50 }
  0xc9   :  { %v188_v52 = vmul.f32 %v308_v51, %v185_v48  ;;  %vm193_vm1 = vweird.f32 %v308_v51  ;;  %311 = vtanh.f32 %v177_v40 }
  0xca   :  { %vm194_vm2 = vmor %vm192_vm0, %vm193_vm1  ;;  %v214_v7 = vor.u32 1.1754944e-38, %v213_v0  ;;  %vm212_vm7 = vcmp.eq.f32.partialorder %v211_v3, 8.507059e+37 }
  0xcb   :  { %v189_v53 = vsub.f32 1.0, %v188_v52 }
  0xcd   :  { %v190_v55 = vmul.f32 %v308_v51, %v189_v53 }
  0xce   :  { %v310_v57 = vpop.eup %309 }
  0xcf   :  { %v191_v58 = vadd.f32 %v308_v51, %v190_v55  ;;  %v203_v59 = vmul.f32 %v310_v57, %v186_v50  ;;  %vm208_vm4 = vweird.f32 %v310_v57  ;;  %v312_v9 = vpop.eup %311 }
  0xd0   :  { %vm209_vm6 = vmor %vm207_vm5, %vm208_vm4  ;;  %v226_v13 = vsub.f32 %v312_v9, %v518_v32 }
  0xd1   :  { %v195_v62 = vsel %vm194_vm2, %v308_v51, %v191_v58  ;;  %v204_v63 = vsub.f32 1.0, %v203_v59 }
  0xd2   :  { %v200_v1 = vsel %vm197_vm3, %v199_v61, %v195_v62 }
  0xd3   :  { %v205_v2 = vmul.f32 %v310_v57, %v204_v63  ;;  %v220_v4 = vmul.f32 %v302_v60, %v200_v1 }
  0xd5   :  { %v206_v5 = vadd.f32 %v310_v57, %v205_v2  ;;  %v222_v6 = vadd.f32 1e-06, %v220_v4 }
  0xd7   :  { %v210_v8 = vsel %vm209_vm6, %v310_v57, %v206_v5  ;;  %313 = vrcp.f32 %v222_v6 }
  0xd8   :  { %v215_v10 = vsel %vm212_vm7, %v214_v7, %v210_v8  ;;  %315 = vtanh.f32 %v178_v45 }
  0xd9   :  { %v221_v11 = vmul.f32 %v302_v60, %v215_v10 }
  0xdb   :  { %v223_v12 = vadd.f32 1e-06, %v221_v11 }
  0xdd   :  { %v314_v14 = vpop.eup %313  ;;  %317 = vrcp.f32 %v223_v12 }
  0xde   :  { %v230_v16 = vmul.f32 %v314_v14, %v226_v13  ;;  %v316_v17 = vpop.eup %315 }
  0xdf   :  { %v227_v19 = vsub.f32 %v316_v17, %v520_v33 }
  0xe0   :  { %v233_v18 = vmul.f32 %v232_v15, %v230_v16 }
  0xe2   :  { %v235_v20 = vadd.f32 %v233_v18, %v518_v32 }
  0xe3   :  { %v318_v21 = vpop.eup %317 }
  0xe4   :  { %v231_v22 = vmul.f32 %v318_v21, %v227_v19  ;;  %237 = vst [vmem:[#allocation12] sm:$0xff] %v235_v20 }
  0xe6   :  { %v234_v23 = vmul.f32 %v232_v15, %v231_v22 }
  0xe8   :  { %v236_v24 = vadd.f32 %v234_v23, %v520_v33 }
  0xea   :  { %238 = vst [vmem:[#allocation12 + $0x8] sm:$0xff] %v236_v24 }
  0xeb   :  { %251 = dma.vmem_to_hbm [thread:$0]  %s244_s24, 256, %s246_s27, [#allocation6], %s448_s9, %s448_s9, %s449_s10  }
  0xec   :  { %445 = dma.done.wait [#allocation6], 256  }
  0xed   :  { %446 = vsyncadd [#allocation6], 4294967040 }
  0xee   :  { %256 = vsyncpa [#allocation5], 1 }
  0xef   :  { %257 = vsyncpa [#allocation8], 1 }
  0xf0   :  { %258 = vsyncpa [#allocation11], 1 }
  0xf1   :  { %259 = vsyncpa [#allocation6], 1 }

</bundles_post_ra>
